<compile_context>
chip_gen: v5e
topology: v5e:2x2
jax: 0.10.0
libtpu: 0.0.40
codegen_flags: <defaults>
</compile_context>

<pallas_src>
import functools

import jax
import jax.numpy as jnp
from jax import lax
from jax.experimental import pallas as pl
from jax.experimental.pallas import tpu as pltpu


# ------------------------- fused Pallas kernel -------------------------

def fused_forward_kernel(x1_ref, x2_ref,
                         wq_ref, bq_ref, wk_ref, bk_ref, wv_ref, bv_ref,
                         wo_ref, bo_ref,
                         dense_w_ref, dense_b_ref,
                         inter_w_ref, inter_b_ref,
                         final_w_ref, final_b_ref,
                         o_ref, *, num_heads, scale):
    xq = x1_ref[0]                       # (L, E) query tokens of this batch element
    xkv = x2_ref[0]                      # (S, E) key/value tokens
    L, E = xq.shape

    # ---- multi-head attention with per-head weights (no lane slicing, no concat) ----
    # TODO(synk): attention dropout (hidden_dropout_prob) only applies in training
    # mode; this is the eval-mode forward (dropout = identity).
    attn = jnp.zeros((L, E), jnp.float32)
    for h in range(num_heads):           # static unroll, H is small
        qh = jnp.dot(xq, wq_ref[h], preferred_element_type=jnp.float32) + bq_ref[h]   # (L, Dh)
        kh = jnp.dot(xkv, wk_ref[h], preferred_element_type=jnp.float32) + bk_ref[h]  # (S, Dh)
        vh = jnp.dot(xkv, wv_ref[h], preferred_element_type=jnp.float32) + bv_ref[h]  # (S, Dh)
        s = lax.dot_general(qh, kh, (((1,), (1,)), ((), ())),
                            preferred_element_type=jnp.float32) * scale               # (L, S)
        m = jnp.max(s, axis=-1, keepdims=True)
        p = jnp.exp(s - m)
        denom = jnp.sum(p, axis=-1, keepdims=True)
        p = p * pl.reciprocal(denom, approx=True)
        oh = jnp.dot(p, vh, preferred_element_type=jnp.float32)                       # (L, Dh)
        # out_proj folded into the head loop: no (L, E) lane-concat is ever built
        attn = attn + jnp.dot(oh, wo_ref[h], preferred_element_type=jnp.float32)      # (L, E)
    a = attn + bo_ref[...]

    # ---- dense (*0.5 fused) -> intermediate -> output, all (in, out) layouts ----
    d = (jnp.dot(a, dense_w_ref[...], preferred_element_type=jnp.float32)
         + dense_b_ref[...]) * 0.5
    i = jnp.dot(d, inter_w_ref[...], preferred_element_type=jnp.float32) + inter_b_ref[...]
    out = (jnp.dot(i, final_w_ref[...], preferred_element_type=jnp.float32)
           + final_b_ref[...])

    o_ref[0] = out.astype(o_ref.dtype)


# ------------------------- one-time host-side weight re-layout -------------------------

def prepare_params(params, num_heads):
    """Re-lay-out PyTorch (out, in) weights once on the host.

    * in_proj  -> per-head (H, E, Dh) right-multiply operands (x @ W^T per head)
    * out_proj -> per-head (H, Dh, E) row-blocks of W^T (folded into head loop)
    * MLP      -> plain (in, out) layout
    """
    E = params["dense_w"].shape[0]
    H = num_heads
    Dh = E // H
    wq, wk, wv = jnp.split(params["in_proj_w"], 3, axis=0)       # each (E, E), (out, in)
    bq, bk, bv = jnp.split(params["in_proj_b"], 3, axis=0)       # each (E,)

    def per_head_rhs(w):                 # (E_out, E_in) -> (H, E_in, Dh)
        return jnp.transpose(w.T.reshape(E, H, Dh), (1, 0, 2))

    return {
        "wq": per_head_rhs(wq), "bq": bq.reshape(H, 1, Dh),
        "wk": per_head_rhs(wk), "bk": bk.reshape(H, 1, Dh),
        "wv": per_head_rhs(wv), "bv": bv.reshape(H, 1, Dh),
        "wo": params["out_proj_w"].T.reshape(H, Dh, E),
        "bo": params["out_proj_b"].reshape(1, E),
        "dense_w": params["dense_w"].T,
        "dense_b": params["dense_b"].reshape(1, E),
        "inter_w": params["intermediate_w"].T,
        "inter_b": params["intermediate_b"].reshape(1, E),
        "final_w": params["output_w"].T,
        "final_b": params["output_b"].reshape(1, E),
    }


# ------------------------- wrapper -------------------------

def model_forward(x1, x2, prepped, num_heads):
    """Batch-major I/O: x1 (N, L, E) query, x2 (N, S, E) key/value -> (N, L, E)."""
    N, L, E = x1.shape
    S = x2.shape[1]
    assert x2.shape[0] == N and x2.shape[2] == E
    assert E % num_heads == 0, "hidden_size must be divisible by num_heads"
    H = num_heads
    Dh = E // H
    scale = 1.0 / (Dh ** 0.5)

    def full(shape):
        nd = len(shape)
        return pl.BlockSpec(shape, lambda b, _nd=nd: (0,) * _nd)

    cost = pl.CostEstimate(
        flops=2 * N * (E * E * (L + 2 * S) + 2 * L * S * E + 4 * L * E * E),
        transcendentals=N * H * L * S,
        bytes_accessed=4 * (N * (L + S) * E + 7 * E * E + 7 * E + N * L * E),
    )

    return pl.pallas_call(
        functools.partial(fused_forward_kernel, num_heads=num_heads, scale=scale),
        out_shape=jax.ShapeDtypeStruct((N, L, E), x1.dtype),
        grid=(N,),
        in_specs=[
            pl.BlockSpec((1, L, E), lambda b: (b, 0, 0)),   # x1: per-batch block
            pl.BlockSpec((1, S, E), lambda b: (b, 0, 0)),   # x2: per-batch block
            full((H, E, Dh)), full((H, 1, Dh)),             # q weights / bias (per head)
            full((H, E, Dh)), full((H, 1, Dh)),             # k weights / bias
            full((H, E, Dh)), full((H, 1, Dh)),             # v weights / bias
            full((H, Dh, E)), full((1, E)),                 # out_proj (per head) / bias
            full((E, E)), full((1, E)),                     # dense
            full((E, E)), full((1, E)),                     # intermediate
            full((E, E)), full((1, E)),                     # output
        ],
        out_specs=pl.BlockSpec((1, L, E), lambda b: (b, 0, 0)),
        compiler_params=pltpu.CompilerParams(
            dimension_semantics=("parallel",)),
        cost_estimate=cost,
    )(x1, x2,
      prepped["wq"], prepped["bq"], prepped["wk"], prepped["bk"],
      prepped["wv"], prepped["bv"], prepped["wo"], prepped["bo"],
      prepped["dense_w"], prepped["dense_b"],
      prepped["inter_w"], prepped["inter_b"],
      prepped["final_w"], prepped["final_b"])


# ------------------------- pure-JAX reference (for checking) -------------------------

def reference_forward(x1, x2, params, num_heads):
    """Same math as the PyTorch module, batch-major (N, L, E) layout."""
    N, L, E = x1.shape
    S = x2.shape[1]
    Dh = E // num_heads
    scale = 1.0 / (Dh ** 0.5)
    wq, wk, wv = jnp.split(params["in_proj_w"], 3, axis=0)
    bq, bk, bv = jnp.split(params["in_proj_b"], 3, axis=0)
    q = x1 @ wq.T + bq
    k = x2 @ wk.T + bk
    v = x2 @ wv.T + bv
    q = q.reshape(N, L, num_heads, Dh).transpose(0, 2, 1, 3)
    k = k.reshape(N, S, num_heads, Dh).transpose(0, 2, 1, 3)
    v = v.reshape(N, S, num_heads, Dh).transpose(0, 2, 1, 3)
    s = jnp.einsum("nhld,nhsd->nhls", q, k) * scale
    p = jax.nn.softmax(s, axis=-1)
    o = jnp.einsum("nhls,nhsd->nhld", p, v)
    o = o.transpose(0, 2, 1, 3).reshape(N, L, E)
    o = o @ params["out_proj_w"].T + params["out_proj_b"]
    d = (o @ params["dense_w"].T + params["dense_b"]) * 0.5
    i = d @ params["intermediate_w"].T + params["intermediate_b"]
    return i @ params["output_w"].T + params["output_b"]


# ------------------------- setup / main -------------------------

def init_params(key, hidden_size):
    E = hidden_size
    keys = jax.random.split(key, 6)
    std = 0.1
    return {
        # PyTorch (out, in) layouts (re-laid-out once by prepare_params).
        "in_proj_w":       jax.random.normal(keys[0], (3 * E, E), jnp.float32) * std,
        "in_proj_b":       jax.random.normal(keys[5], (3 * E,), jnp.float32) * std,
        "out_proj_w":      jax.random.normal(keys[1], (E, E), jnp.float32) * std,
        "out_proj_b":      jnp.zeros((E,), jnp.float32),
        "dense_w":         jax.random.normal(keys[2], (E, E), jnp.float32) * std,
        "dense_b":         jnp.zeros((E,), jnp.float32),
        "intermediate_w":  jax.random.normal(keys[3], (E, E), jnp.float32) * std,
        "intermediate_b":  jnp.zeros((E,), jnp.float32),
        "output_w":        jax.random.normal(keys[4], (E, E), jnp.float32) * std,
        "output_b":        jnp.zeros((E,), jnp.float32),
    }


if __name__ == "__main__":
    hidden_size = 32
    num_heads = 4
    N, L, S = 2, 8, 16   # batch, query seq, key/value seq

    key = jax.random.PRNGKey(0)
    k1, k2, kp = jax.random.split(key, 3)
    x1 = jax.random.normal(k1, (N, L, hidden_size), jnp.float32)   # query (batch-major)
    x2 = jax.random.normal(k2, (N, S, hidden_size), jnp.float32)   # key/value

    params = init_params(kp, hidden_size)
    prepped = prepare_params(params, num_heads)   # one-time weight re-layout

    out = model_forward(x1, x2, prepped, num_heads)
    jax.block_until_ready(out)
    assert out.shape == (N, L, hidden_size)

    ref = reference_forward(x1, x2, params, num_heads)
    rel_err = float(jnp.max(jnp.abs(out - ref)) / (jnp.max(jnp.abs(ref)) + 1e-6))
    assert rel_err < 2e-2, f"mismatch vs reference: rel_err={rel_err}"

    print("KERNEL_OK")
</pallas_src>

<mosaic_0001>
module attributes {stable_mosaic.version = 11 : i64} {
  func.func @fused_forward_kernel(%arg0: i32, %arg1: memref<1x8x32xf32, #tpu.memory_space<vmem>>, %arg2: memref<1x16x32xf32, #tpu.memory_space<vmem>>, %arg3: memref<4x32x8xf32, #tpu.memory_space<vmem>>, %arg4: memref<4x1x8xf32, #tpu.memory_space<vmem>>, %arg5: memref<4x32x8xf32, #tpu.memory_space<vmem>>, %arg6: memref<4x1x8xf32, #tpu.memory_space<vmem>>, %arg7: memref<4x32x8xf32, #tpu.memory_space<vmem>>, %arg8: memref<4x1x8xf32, #tpu.memory_space<vmem>>, %arg9: memref<4x8x32xf32, #tpu.memory_space<vmem>>, %arg10: memref<1x32xf32, #tpu.memory_space<vmem>>, %arg11: memref<32x32xf32, #tpu.memory_space<vmem>>, %arg12: memref<1x32xf32, #tpu.memory_space<vmem>>, %arg13: memref<32x32xf32, #tpu.memory_space<vmem>>, %arg14: memref<1x32xf32, #tpu.memory_space<vmem>>, %arg15: memref<32x32xf32, #tpu.memory_space<vmem>>, %arg16: memref<1x32xf32, #tpu.memory_space<vmem>>, %arg17: memref<1x8x32xf32, #tpu.memory_space<vmem>>) attributes {dimension_semantics = [#tpu.dimension_semantics<parallel>], iteration_bounds = array<i64: 2>, scalar_prefetch = 0 : i64, scratch_operands = 0 : i64, tpu.core_type = #tpu.core_type<tc>, window_params = [{transform_indices = @transform_0, window_bounds = array<i64: 1, 8, 32>}, {transform_indices = @transform_1, window_bounds = array<i64: 1, 16, 32>}, {pipeline_mode = #tpu.pipeline_mode<synchronous>, transform_indices = @transform_2, window_bounds = array<i64: 4, 32, 8>}, {pipeline_mode = #tpu.pipeline_mode<synchronous>, transform_indices = @transform_3, window_bounds = array<i64: 4, 1, 8>}, {pipeline_mode = #tpu.pipeline_mode<synchronous>, transform_indices = @transform_4, window_bounds = array<i64: 4, 32, 8>}, {pipeline_mode = #tpu.pipeline_mode<synchronous>, transform_indices = @transform_5, window_bounds = array<i64: 4, 1, 8>}, {pipeline_mode = #tpu.pipeline_mode<synchronous>, transform_indices = @transform_6, window_bounds = array<i64: 4, 32, 8>}, {pipeline_mode = #tpu.pipeline_mode<synchronous>, transform_indices = @transform_7, window_bounds = array<i64: 4, 1, 8>}, {pipeline_mode = #tpu.pipeline_mode<synchronous>, transform_indices = @transform_8, window_bounds = array<i64: 4, 8, 32>}, {pipeline_mode = #tpu.pipeline_mode<synchronous>, transform_indices = @transform_9, window_bounds = array<i64: 1, 32>}, {pipeline_mode = #tpu.pipeline_mode<synchronous>, transform_indices = @transform_10, window_bounds = array<i64: 32, 32>}, {pipeline_mode = #tpu.pipeline_mode<synchronous>, transform_indices = @transform_11, window_bounds = array<i64: 1, 32>}, {pipeline_mode = #tpu.pipeline_mode<synchronous>, transform_indices = @transform_12, window_bounds = array<i64: 32, 32>}, {pipeline_mode = #tpu.pipeline_mode<synchronous>, transform_indices = @transform_13, window_bounds = array<i64: 1, 32>}, {pipeline_mode = #tpu.pipeline_mode<synchronous>, transform_indices = @transform_14, window_bounds = array<i64: 32, 32>}, {pipeline_mode = #tpu.pipeline_mode<synchronous>, transform_indices = @transform_15, window_bounds = array<i64: 1, 32>}, {transform_indices = @transform_16, window_bounds = array<i64: 1, 8, 32>}]} {
    %c0 = arith.constant 0 : index
    %c0_0 = arith.constant 0 : index
    %c0_1 = arith.constant 0 : index
    %0 = vector.load %arg1[%c0, %c0_0, %c0_1] : memref<1x8x32xf32, #tpu.memory_space<vmem>>, vector<1x8x32xf32>
    %1 = vector.shape_cast %0 : vector<1x8x32xf32> to vector<8x32xf32>
    %c0_2 = arith.constant 0 : index
    %c0_3 = arith.constant 0 : index
    %c0_4 = arith.constant 0 : index
    %2 = vector.load %arg2[%c0_2, %c0_3, %c0_4] : memref<1x16x32xf32, #tpu.memory_space<vmem>>, vector<1x16x32xf32>
    %3 = vector.shape_cast %2 : vector<1x16x32xf32> to vector<16x32xf32>
    %cst = arith.constant 0.000000e+00 : f32
    %4 = vector.broadcast %cst : f32 to vector<8x32xf32>
    %c0_5 = arith.constant 0 : index
    %c0_6 = arith.constant 0 : index
    %c0_7 = arith.constant 0 : index
    %5 = vector.load %arg3[%c0_5, %c0_6, %c0_7] : memref<4x32x8xf32, #tpu.memory_space<vmem>>, vector<1x32x8xf32>
    %6 = vector.shape_cast %5 : vector<1x32x8xf32> to vector<32x8xf32>
    %cst_8 = arith.constant dense<0.000000e+00> : vector<8x8xf32>
    %7 = tpu.matmul %1, %6, %cst_8 {dimension_numbers = #tpu.dot_dimension_numbers<[1], [0], [0], [1], [0, 0, 1, 1], [], []>} : vector<8x32xf32>, vector<32x8xf32>, vector<8x8xf32> -> vector<8x8xf32>
    %c0_9 = arith.constant 0 : index
    %c0_10 = arith.constant 0 : index
    %c0_11 = arith.constant 0 : index
    %8 = vector.load %arg4[%c0_9, %c0_10, %c0_11] : memref<4x1x8xf32, #tpu.memory_space<vmem>>, vector<1x1x8xf32>
    %9 = vector.shape_cast %8 : vector<1x1x8xf32> to vector<1x8xf32>
    %10 = vector.broadcast %9 : vector<1x8xf32> to vector<8x8xf32>
    %11 = arith.addf %7, %10 : vector<8x8xf32>
    %c0_12 = arith.constant 0 : index
    %c0_13 = arith.constant 0 : index
    %c0_14 = arith.constant 0 : index
    %12 = vector.load %arg5[%c0_12, %c0_13, %c0_14] : memref<4x32x8xf32, #tpu.memory_space<vmem>>, vector<1x32x8xf32>
    %13 = vector.shape_cast %12 : vector<1x32x8xf32> to vector<32x8xf32>
    %cst_15 = arith.constant dense<0.000000e+00> : vector<16x8xf32>
    %14 = tpu.matmul %3, %13, %cst_15 {dimension_numbers = #tpu.dot_dimension_numbers<[1], [0], [0], [1], [0, 0, 1, 1], [], []>} : vector<16x32xf32>, vector<32x8xf32>, vector<16x8xf32> -> vector<16x8xf32>
    %c0_16 = arith.constant 0 : index
    %c0_17 = arith.constant 0 : index
    %c0_18 = arith.constant 0 : index
    %15 = vector.load %arg6[%c0_16, %c0_17, %c0_18] : memref<4x1x8xf32, #tpu.memory_space<vmem>>, vector<1x1x8xf32>
    %16 = vector.shape_cast %15 : vector<1x1x8xf32> to vector<1x8xf32>
    %17 = vector.broadcast %16 : vector<1x8xf32> to vector<16x8xf32>
    %18 = arith.addf %14, %17 : vector<16x8xf32>
    %c0_19 = arith.constant 0 : index
    %c0_20 = arith.constant 0 : index
    %c0_21 = arith.constant 0 : index
    %19 = vector.load %arg7[%c0_19, %c0_20, %c0_21] : memref<4x32x8xf32, #tpu.memory_space<vmem>>, vector<1x32x8xf32>
    %20 = vector.shape_cast %19 : vector<1x32x8xf32> to vector<32x8xf32>
    %cst_22 = arith.constant dense<0.000000e+00> : vector<16x8xf32>
    %21 = tpu.matmul %3, %20, %cst_22 {dimension_numbers = #tpu.dot_dimension_numbers<[1], [0], [0], [1], [0, 0, 1, 1], [], []>} : vector<16x32xf32>, vector<32x8xf32>, vector<16x8xf32> -> vector<16x8xf32>
    %c0_23 = arith.constant 0 : index
    %c0_24 = arith.constant 0 : index
    %c0_25 = arith.constant 0 : index
    %22 = vector.load %arg8[%c0_23, %c0_24, %c0_25] : memref<4x1x8xf32, #tpu.memory_space<vmem>>, vector<1x1x8xf32>
    %23 = vector.shape_cast %22 : vector<1x1x8xf32> to vector<1x8xf32>
    %24 = vector.broadcast %23 : vector<1x8xf32> to vector<16x8xf32>
    %25 = arith.addf %21, %24 : vector<16x8xf32>
    %cst_26 = arith.constant dense<0.000000e+00> : vector<8x16xf32>
    %26 = tpu.matmul %11, %18, %cst_26 {dimension_numbers = #tpu.dot_dimension_numbers<[1], [1], [0], [0], [0, 0, 1, 0], [], []>} : vector<8x8xf32>, vector<16x8xf32>, vector<8x16xf32> -> vector<8x16xf32>
    %cst_27 = arith.constant 0.353553385 : f32
    %27 = vector.broadcast %cst_27 : f32 to vector<8x16xf32>
    %28 = arith.mulf %26, %27 : vector<8x16xf32>
    %cst_28 = arith.constant dense<0xFF800000> : vector<8xf32>
    %29 = vector.multi_reduction <maximumf>, %28, %cst_28 [1] : vector<8x16xf32> to vector<8xf32>
    %30 = vector.shape_cast %29 : vector<8xf32> to vector<8x1xf32>
    %31 = vector.broadcast %30 : vector<8x1xf32> to vector<8x16xf32>
    %32 = arith.subf %28, %31 : vector<8x16xf32>
    %33 = math.exp %32 : vector<8x16xf32>
    %cst_29 = arith.constant dense<0.000000e+00> : vector<8xf32>
    %34 = vector.multi_reduction <add>, %33, %cst_29 [1] : vector<8x16xf32> to vector<8xf32>
    %35 = vector.shape_cast %34 : vector<8xf32> to vector<8x1xf32>
    %36 = tpu.reciprocal %35 {approx = true} : vector<8x1xf32> -> vector<8x1xf32>
    %37 = vector.broadcast %36 : vector<8x1xf32> to vector<8x16xf32>
    %38 = arith.mulf %33, %37 : vector<8x16xf32>
    %cst_30 = arith.constant dense<0.000000e+00> : vector<8x8xf32>
    %39 = tpu.matmul %38, %25, %cst_30 {dimension_numbers = #tpu.dot_dimension_numbers<[1], [0], [0], [1], [0, 0, 1, 1], [], []>} : vector<8x16xf32>, vector<16x8xf32>, vector<8x8xf32> -> vector<8x8xf32>
    %c0_31 = arith.constant 0 : index
    %c0_32 = arith.constant 0 : index
    %c0_33 = arith.constant 0 : index
    %40 = vector.load %arg9[%c0_31, %c0_32, %c0_33] : memref<4x8x32xf32, #tpu.memory_space<vmem>>, vector<1x8x32xf32>
    %41 = vector.shape_cast %40 : vector<1x8x32xf32> to vector<8x32xf32>
    %cst_34 = arith.constant dense<0.000000e+00> : vector<8x32xf32>
    %42 = tpu.matmul %39, %41, %cst_34 {dimension_numbers = #tpu.dot_dimension_numbers<[1], [0], [0], [1], [0, 0, 1, 1], [], []>} : vector<8x8xf32>, vector<8x32xf32>, vector<8x32xf32> -> vector<8x32xf32>
    %43 = arith.addf %4, %42 : vector<8x32xf32>
    %c1 = arith.constant 1 : index
    %c0_35 = arith.constant 0 : index
    %c0_36 = arith.constant 0 : index
    %44 = vector.load %arg3[%c1, %c0_35, %c0_36] : memref<4x32x8xf32, #tpu.memory_space<vmem>>, vector<1x32x8xf32>
    %45 = vector.shape_cast %44 : vector<1x32x8xf32> to vector<32x8xf32>
    %cst_37 = arith.constant dense<0.000000e+00> : vector<8x8xf32>
    %46 = tpu.matmul %1, %45, %cst_37 {dimension_numbers = #tpu.dot_dimension_numbers<[1], [0], [0], [1], [0, 0, 1, 1], [], []>} : vector<8x32xf32>, vector<32x8xf32>, vector<8x8xf32> -> vector<8x8xf32>
    %c1_38 = arith.constant 1 : index
    %c0_39 = arith.constant 0 : index
    %c0_40 = arith.constant 0 : index
    %47 = vector.load %arg4[%c1_38, %c0_39, %c0_40] : memref<4x1x8xf32, #tpu.memory_space<vmem>>, vector<1x1x8xf32>
    %48 = vector.shape_cast %47 : vector<1x1x8xf32> to vector<1x8xf32>
    %49 = vector.broadcast %48 : vector<1x8xf32> to vector<8x8xf32>
    %50 = arith.addf %46, %49 : vector<8x8xf32>
    %c1_41 = arith.constant 1 : index
    %c0_42 = arith.constant 0 : index
    %c0_43 = arith.constant 0 : index
    %51 = vector.load %arg5[%c1_41, %c0_42, %c0_43] : memref<4x32x8xf32, #tpu.memory_space<vmem>>, vector<1x32x8xf32>
    %52 = vector.shape_cast %51 : vector<1x32x8xf32> to vector<32x8xf32>
    %cst_44 = arith.constant dense<0.000000e+00> : vector<16x8xf32>
    %53 = tpu.matmul %3, %52, %cst_44 {dimension_numbers = #tpu.dot_dimension_numbers<[1], [0], [0], [1], [0, 0, 1, 1], [], []>} : vector<16x32xf32>, vector<32x8xf32>, vector<16x8xf32> -> vector<16x8xf32>
    %c1_45 = arith.constant 1 : index
    %c0_46 = arith.constant 0 : index
    %c0_47 = arith.constant 0 : index
    %54 = vector.load %arg6[%c1_45, %c0_46, %c0_47] : memref<4x1x8xf32, #tpu.memory_space<vmem>>, vector<1x1x8xf32>
    %55 = vector.shape_cast %54 : vector<1x1x8xf32> to vector<1x8xf32>
    %56 = vector.broadcast %55 : vector<1x8xf32> to vector<16x8xf32>
    %57 = arith.addf %53, %56 : vector<16x8xf32>
    %c1_48 = arith.constant 1 : index
    %c0_49 = arith.constant 0 : index
    %c0_50 = arith.constant 0 : index
    %58 = vector.load %arg7[%c1_48, %c0_49, %c0_50] : memref<4x32x8xf32, #tpu.memory_space<vmem>>, vector<1x32x8xf32>
    %59 = vector.shape_cast %58 : vector<1x32x8xf32> to vector<32x8xf32>
    %cst_51 = arith.constant dense<0.000000e+00> : vector<16x8xf32>
    %60 = tpu.matmul %3, %59, %cst_51 {dimension_numbers = #tpu.dot_dimension_numbers<[1], [0], [0], [1], [0, 0, 1, 1], [], []>} : vector<16x32xf32>, vector<32x8xf32>, vector<16x8xf32> -> vector<16x8xf32>
    %c1_52 = arith.constant 1 : index
    %c0_53 = arith.constant 0 : index
    %c0_54 = arith.constant 0 : index
    %61 = vector.load %arg8[%c1_52, %c0_53, %c0_54] : memref<4x1x8xf32, #tpu.memory_space<vmem>>, vector<1x1x8xf32>
    %62 = vector.shape_cast %61 : vector<1x1x8xf32> to vector<1x8xf32>
    %63 = vector.broadcast %62 : vector<1x8xf32> to vector<16x8xf32>
    %64 = arith.addf %60, %63 : vector<16x8xf32>
    %cst_55 = arith.constant dense<0.000000e+00> : vector<8x16xf32>
    %65 = tpu.matmul %50, %57, %cst_55 {dimension_numbers = #tpu.dot_dimension_numbers<[1], [1], [0], [0], [0, 0, 1, 0], [], []>} : vector<8x8xf32>, vector<16x8xf32>, vector<8x16xf32> -> vector<8x16xf32>
    %cst_56 = arith.constant 0.353553385 : f32
    %66 = vector.broadcast %cst_56 : f32 to vector<8x16xf32>
    %67 = arith.mulf %65, %66 : vector<8x16xf32>
    %cst_57 = arith.constant dense<0xFF800000> : vector<8xf32>
    %68 = vector.multi_reduction <maximumf>, %67, %cst_57 [1] : vector<8x16xf32> to vector<8xf32>
    %69 = vector.shape_cast %68 : vector<8xf32> to vector<8x1xf32>
    %70 = vector.broadcast %69 : vector<8x1xf32> to vector<8x16xf32>
    %71 = arith.subf %67, %70 : vector<8x16xf32>
    %72 = math.exp %71 : vector<8x16xf32>
    %cst_58 = arith.constant dense<0.000000e+00> : vector<8xf32>
    %73 = vector.multi_reduction <add>, %72, %cst_58 [1] : vector<8x16xf32> to vector<8xf32>
    %74 = vector.shape_cast %73 : vector<8xf32> to vector<8x1xf32>
    %75 = tpu.reciprocal %74 {approx = true} : vector<8x1xf32> -> vector<8x1xf32>
    %76 = vector.broadcast %75 : vector<8x1xf32> to vector<8x16xf32>
    %77 = arith.mulf %72, %76 : vector<8x16xf32>
    %cst_59 = arith.constant dense<0.000000e+00> : vector<8x8xf32>
    %78 = tpu.matmul %77, %64, %cst_59 {dimension_numbers = #tpu.dot_dimension_numbers<[1], [0], [0], [1], [0, 0, 1, 1], [], []>} : vector<8x16xf32>, vector<16x8xf32>, vector<8x8xf32> -> vector<8x8xf32>
    %c1_60 = arith.constant 1 : index
    %c0_61 = arith.constant 0 : index
    %c0_62 = arith.constant 0 : index
    %79 = vector.load %arg9[%c1_60, %c0_61, %c0_62] : memref<4x8x32xf32, #tpu.memory_space<vmem>>, vector<1x8x32xf32>
    %80 = vector.shape_cast %79 : vector<1x8x32xf32> to vector<8x32xf32>
    %cst_63 = arith.constant dense<0.000000e+00> : vector<8x32xf32>
    %81 = tpu.matmul %78, %80, %cst_63 {dimension_numbers = #tpu.dot_dimension_numbers<[1], [0], [0], [1], [0, 0, 1, 1], [], []>} : vector<8x8xf32>, vector<8x32xf32>, vector<8x32xf32> -> vector<8x32xf32>
    %82 = arith.addf %43, %81 : vector<8x32xf32>
    %c2 = arith.constant 2 : index
    %c0_64 = arith.constant 0 : index
    %c0_65 = arith.constant 0 : index
    %83 = vector.load %arg3[%c2, %c0_64, %c0_65] : memref<4x32x8xf32, #tpu.memory_space<vmem>>, vector<1x32x8xf32>
    %84 = vector.shape_cast %83 : vector<1x32x8xf32> to vector<32x8xf32>
    %cst_66 = arith.constant dense<0.000000e+00> : vector<8x8xf32>
    %85 = tpu.matmul %1, %84, %cst_66 {dimension_numbers = #tpu.dot_dimension_numbers<[1], [0], [0], [1], [0, 0, 1, 1], [], []>} : vector<8x32xf32>, vector<32x8xf32>, vector<8x8xf32> -> vector<8x8xf32>
    %c2_67 = arith.constant 2 : index
    %c0_68 = arith.constant 0 : index
    %c0_69 = arith.constant 0 : index
    %86 = vector.load %arg4[%c2_67, %c0_68, %c0_69] : memref<4x1x8xf32, #tpu.memory_space<vmem>>, vector<1x1x8xf32>
    %87 = vector.shape_cast %86 : vector<1x1x8xf32> to vector<1x8xf32>
    %88 = vector.broadcast %87 : vector<1x8xf32> to vector<8x8xf32>
    %89 = arith.addf %85, %88 : vector<8x8xf32>
    %c2_70 = arith.constant 2 : index
    %c0_71 = arith.constant 0 : index
    %c0_72 = arith.constant 0 : index
    %90 = vector.load %arg5[%c2_70, %c0_71, %c0_72] : memref<4x32x8xf32, #tpu.memory_space<vmem>>, vector<1x32x8xf32>
    %91 = vector.shape_cast %90 : vector<1x32x8xf32> to vector<32x8xf32>
    %cst_73 = arith.constant dense<0.000000e+00> : vector<16x8xf32>
    %92 = tpu.matmul %3, %91, %cst_73 {dimension_numbers = #tpu.dot_dimension_numbers<[1], [0], [0], [1], [0, 0, 1, 1], [], []>} : vector<16x32xf32>, vector<32x8xf32>, vector<16x8xf32> -> vector<16x8xf32>
    %c2_74 = arith.constant 2 : index
    %c0_75 = arith.constant 0 : index
    %c0_76 = arith.constant 0 : index
    %93 = vector.load %arg6[%c2_74, %c0_75, %c0_76] : memref<4x1x8xf32, #tpu.memory_space<vmem>>, vector<1x1x8xf32>
    %94 = vector.shape_cast %93 : vector<1x1x8xf32> to vector<1x8xf32>
    %95 = vector.broadcast %94 : vector<1x8xf32> to vector<16x8xf32>
    %96 = arith.addf %92, %95 : vector<16x8xf32>
    %c2_77 = arith.constant 2 : index
    %c0_78 = arith.constant 0 : index
    %c0_79 = arith.constant 0 : index
    %97 = vector.load %arg7[%c2_77, %c0_78, %c0_79] : memref<4x32x8xf32, #tpu.memory_space<vmem>>, vector<1x32x8xf32>
    %98 = vector.shape_cast %97 : vector<1x32x8xf32> to vector<32x8xf32>
    %cst_80 = arith.constant dense<0.000000e+00> : vector<16x8xf32>
    %99 = tpu.matmul %3, %98, %cst_80 {dimension_numbers = #tpu.dot_dimension_numbers<[1], [0], [0], [1], [0, 0, 1, 1], [], []>} : vector<16x32xf32>, vector<32x8xf32>, vector<16x8xf32> -> vector<16x8xf32>
    %c2_81 = arith.constant 2 : index
    %c0_82 = arith.constant 0 : index
    %c0_83 = arith.constant 0 : index
    %100 = vector.load %arg8[%c2_81, %c0_82, %c0_83] : memref<4x1x8xf32, #tpu.memory_space<vmem>>, vector<1x1x8xf32>
    %101 = vector.shape_cast %100 : vector<1x1x8xf32> to vector<1x8xf32>
    %102 = vector.broadcast %101 : vector<1x8xf32> to vector<16x8xf32>
    %103 = arith.addf %99, %102 : vector<16x8xf32>
    %cst_84 = arith.constant dense<0.000000e+00> : vector<8x16xf32>
    %104 = tpu.matmul %89, %96, %cst_84 {dimension_numbers = #tpu.dot_dimension_numbers<[1], [1], [0], [0], [0, 0, 1, 0], [], []>} : vector<8x8xf32>, vector<16x8xf32>, vector<8x16xf32> -> vector<8x16xf32>
    %cst_85 = arith.constant 0.353553385 : f32
    %105 = vector.broadcast %cst_85 : f32 to vector<8x16xf32>
    %106 = arith.mulf %104, %105 : vector<8x16xf32>
    %cst_86 = arith.constant dense<0xFF800000> : vector<8xf32>
    %107 = vector.multi_reduction <maximumf>, %106, %cst_86 [1] : vector<8x16xf32> to vector<8xf32>
    %108 = vector.shape_cast %107 : vector<8xf32> to vector<8x1xf32>
    %109 = vector.broadcast %108 : vector<8x1xf32> to vector<8x16xf32>
    %110 = arith.subf %106, %109 : vector<8x16xf32>
    %111 = math.exp %110 : vector<8x16xf32>
    %cst_87 = arith.constant dense<0.000000e+00> : vector<8xf32>
    %112 = vector.multi_reduction <add>, %111, %cst_87 [1] : vector<8x16xf32> to vector<8xf32>
    %113 = vector.shape_cast %112 : vector<8xf32> to vector<8x1xf32>
    %114 = tpu.reciprocal %113 {approx = true} : vector<8x1xf32> -> vector<8x1xf32>
    %115 = vector.broadcast %114 : vector<8x1xf32> to vector<8x16xf32>
    %116 = arith.mulf %111, %115 : vector<8x16xf32>
    %cst_88 = arith.constant dense<0.000000e+00> : vector<8x8xf32>
    %117 = tpu.matmul %116, %103, %cst_88 {dimension_numbers = #tpu.dot_dimension_numbers<[1], [0], [0], [1], [0, 0, 1, 1], [], []>} : vector<8x16xf32>, vector<16x8xf32>, vector<8x8xf32> -> vector<8x8xf32>
    %c2_89 = arith.constant 2 : index
    %c0_90 = arith.constant 0 : index
    %c0_91 = arith.constant 0 : index
    %118 = vector.load %arg9[%c2_89, %c0_90, %c0_91] : memref<4x8x32xf32, #tpu.memory_space<vmem>>, vector<1x8x32xf32>
    %119 = vector.shape_cast %118 : vector<1x8x32xf32> to vector<8x32xf32>
    %cst_92 = arith.constant dense<0.000000e+00> : vector<8x32xf32>
    %120 = tpu.matmul %117, %119, %cst_92 {dimension_numbers = #tpu.dot_dimension_numbers<[1], [0], [0], [1], [0, 0, 1, 1], [], []>} : vector<8x8xf32>, vector<8x32xf32>, vector<8x32xf32> -> vector<8x32xf32>
    %121 = arith.addf %82, %120 : vector<8x32xf32>
    %c3 = arith.constant 3 : index
    %c0_93 = arith.constant 0 : index
    %c0_94 = arith.constant 0 : index
    %122 = vector.load %arg3[%c3, %c0_93, %c0_94] : memref<4x32x8xf32, #tpu.memory_space<vmem>>, vector<1x32x8xf32>
    %123 = vector.shape_cast %122 : vector<1x32x8xf32> to vector<32x8xf32>
    %cst_95 = arith.constant dense<0.000000e+00> : vector<8x8xf32>
    %124 = tpu.matmul %1, %123, %cst_95 {dimension_numbers = #tpu.dot_dimension_numbers<[1], [0], [0], [1], [0, 0, 1, 1], [], []>} : vector<8x32xf32>, vector<32x8xf32>, vector<8x8xf32> -> vector<8x8xf32>
    %c3_96 = arith.constant 3 : index
    %c0_97 = arith.constant 0 : index
    %c0_98 = arith.constant 0 : index
    %125 = vector.load %arg4[%c3_96, %c0_97, %c0_98] : memref<4x1x8xf32, #tpu.memory_space<vmem>>, vector<1x1x8xf32>
    %126 = vector.shape_cast %125 : vector<1x1x8xf32> to vector<1x8xf32>
    %127 = vector.broadcast %126 : vector<1x8xf32> to vector<8x8xf32>
    %128 = arith.addf %124, %127 : vector<8x8xf32>
    %c3_99 = arith.constant 3 : index
    %c0_100 = arith.constant 0 : index
    %c0_101 = arith.constant 0 : index
    %129 = vector.load %arg5[%c3_99, %c0_100, %c0_101] : memref<4x32x8xf32, #tpu.memory_space<vmem>>, vector<1x32x8xf32>
    %130 = vector.shape_cast %129 : vector<1x32x8xf32> to vector<32x8xf32>
    %cst_102 = arith.constant dense<0.000000e+00> : vector<16x8xf32>
    %131 = tpu.matmul %3, %130, %cst_102 {dimension_numbers = #tpu.dot_dimension_numbers<[1], [0], [0], [1], [0, 0, 1, 1], [], []>} : vector<16x32xf32>, vector<32x8xf32>, vector<16x8xf32> -> vector<16x8xf32>
    %c3_103 = arith.constant 3 : index
    %c0_104 = arith.constant 0 : index
    %c0_105 = arith.constant 0 : index
    %132 = vector.load %arg6[%c3_103, %c0_104, %c0_105] : memref<4x1x8xf32, #tpu.memory_space<vmem>>, vector<1x1x8xf32>
    %133 = vector.shape_cast %132 : vector<1x1x8xf32> to vector<1x8xf32>
    %134 = vector.broadcast %133 : vector<1x8xf32> to vector<16x8xf32>
    %135 = arith.addf %131, %134 : vector<16x8xf32>
    %c3_106 = arith.constant 3 : index
    %c0_107 = arith.constant 0 : index
    %c0_108 = arith.constant 0 : index
    %136 = vector.load %arg7[%c3_106, %c0_107, %c0_108] : memref<4x32x8xf32, #tpu.memory_space<vmem>>, vector<1x32x8xf32>
    %137 = vector.shape_cast %136 : vector<1x32x8xf32> to vector<32x8xf32>
    %cst_109 = arith.constant dense<0.000000e+00> : vector<16x8xf32>
    %138 = tpu.matmul %3, %137, %cst_109 {dimension_numbers = #tpu.dot_dimension_numbers<[1], [0], [0], [1], [0, 0, 1, 1], [], []>} : vector<16x32xf32>, vector<32x8xf32>, vector<16x8xf32> -> vector<16x8xf32>
    %c3_110 = arith.constant 3 : index
    %c0_111 = arith.constant 0 : index
    %c0_112 = arith.constant 0 : index
    %139 = vector.load %arg8[%c3_110, %c0_111, %c0_112] : memref<4x1x8xf32, #tpu.memory_space<vmem>>, vector<1x1x8xf32>
    %140 = vector.shape_cast %139 : vector<1x1x8xf32> to vector<1x8xf32>
    %141 = vector.broadcast %140 : vector<1x8xf32> to vector<16x8xf32>
    %142 = arith.addf %138, %141 : vector<16x8xf32>
    %cst_113 = arith.constant dense<0.000000e+00> : vector<8x16xf32>
    %143 = tpu.matmul %128, %135, %cst_113 {dimension_numbers = #tpu.dot_dimension_numbers<[1], [1], [0], [0], [0, 0, 1, 0], [], []>} : vector<8x8xf32>, vector<16x8xf32>, vector<8x16xf32> -> vector<8x16xf32>
    %cst_114 = arith.constant 0.353553385 : f32
    %144 = vector.broadcast %cst_114 : f32 to vector<8x16xf32>
    %145 = arith.mulf %143, %144 : vector<8x16xf32>
    %cst_115 = arith.constant dense<0xFF800000> : vector<8xf32>
    %146 = vector.multi_reduction <maximumf>, %145, %cst_115 [1] : vector<8x16xf32> to vector<8xf32>
    %147 = vector.shape_cast %146 : vector<8xf32> to vector<8x1xf32>
    %148 = vector.broadcast %147 : vector<8x1xf32> to vector<8x16xf32>
    %149 = arith.subf %145, %148 : vector<8x16xf32>
    %150 = math.exp %149 : vector<8x16xf32>
    %cst_116 = arith.constant dense<0.000000e+00> : vector<8xf32>
    %151 = vector.multi_reduction <add>, %150, %cst_116 [1] : vector<8x16xf32> to vector<8xf32>
    %152 = vector.shape_cast %151 : vector<8xf32> to vector<8x1xf32>
    %153 = tpu.reciprocal %152 {approx = true} : vector<8x1xf32> -> vector<8x1xf32>
    %154 = vector.broadcast %153 : vector<8x1xf32> to vector<8x16xf32>
    %155 = arith.mulf %150, %154 : vector<8x16xf32>
    %cst_117 = arith.constant dense<0.000000e+00> : vector<8x8xf32>
    %156 = tpu.matmul %155, %142, %cst_117 {dimension_numbers = #tpu.dot_dimension_numbers<[1], [0], [0], [1], [0, 0, 1, 1], [], []>} : vector<8x16xf32>, vector<16x8xf32>, vector<8x8xf32> -> vector<8x8xf32>
    %c3_118 = arith.constant 3 : index
    %c0_119 = arith.constant 0 : index
    %c0_120 = arith.constant 0 : index
    %157 = vector.load %arg9[%c3_118, %c0_119, %c0_120] : memref<4x8x32xf32, #tpu.memory_space<vmem>>, vector<1x8x32xf32>
    %158 = vector.shape_cast %157 : vector<1x8x32xf32> to vector<8x32xf32>
    %cst_121 = arith.constant dense<0.000000e+00> : vector<8x32xf32>
    %159 = tpu.matmul %156, %158, %cst_121 {dimension_numbers = #tpu.dot_dimension_numbers<[1], [0], [0], [1], [0, 0, 1, 1], [], []>} : vector<8x8xf32>, vector<8x32xf32>, vector<8x32xf32> -> vector<8x32xf32>
    %160 = arith.addf %121, %159 : vector<8x32xf32>
    %c0_122 = arith.constant 0 : index
    %c0_123 = arith.constant 0 : index
    %161 = vector.load %arg10[%c0_122, %c0_123] : memref<1x32xf32, #tpu.memory_space<vmem>>, vector<1x32xf32>
    %162 = vector.broadcast %161 : vector<1x32xf32> to vector<8x32xf32>
    %163 = arith.addf %160, %162 : vector<8x32xf32>
    %c0_124 = arith.constant 0 : index
    %c0_125 = arith.constant 0 : index
    %164 = vector.load %arg11[%c0_124, %c0_125] : memref<32x32xf32, #tpu.memory_space<vmem>>, vector<32x32xf32>
    %cst_126 = arith.constant dense<0.000000e+00> : vector<8x32xf32>
    %165 = tpu.matmul %163, %164, %cst_126 {dimension_numbers = #tpu.dot_dimension_numbers<[1], [0], [0], [1], [0, 0, 1, 1], [], []>} : vector<8x32xf32>, vector<32x32xf32>, vector<8x32xf32> -> vector<8x32xf32>
    %c0_127 = arith.constant 0 : index
    %c0_128 = arith.constant 0 : index
    %166 = vector.load %arg12[%c0_127, %c0_128] : memref<1x32xf32, #tpu.memory_space<vmem>>, vector<1x32xf32>
    %167 = vector.broadcast %166 : vector<1x32xf32> to vector<8x32xf32>
    %168 = arith.addf %165, %167 : vector<8x32xf32>
    %cst_129 = arith.constant 5.000000e-01 : f32
    %169 = vector.broadcast %cst_129 : f32 to vector<8x32xf32>
    %170 = arith.mulf %168, %169 : vector<8x32xf32>
    %c0_130 = arith.constant 0 : index
    %c0_131 = arith.constant 0 : index
    %171 = vector.load %arg13[%c0_130, %c0_131] : memref<32x32xf32, #tpu.memory_space<vmem>>, vector<32x32xf32>
    %cst_132 = arith.constant dense<0.000000e+00> : vector<8x32xf32>
    %172 = tpu.matmul %170, %171, %cst_132 {dimension_numbers = #tpu.dot_dimension_numbers<[1], [0], [0], [1], [0, 0, 1, 1], [], []>} : vector<8x32xf32>, vector<32x32xf32>, vector<8x32xf32> -> vector<8x32xf32>
    %c0_133 = arith.constant 0 : index
    %c0_134 = arith.constant 0 : index
    %173 = vector.load %arg14[%c0_133, %c0_134] : memref<1x32xf32, #tpu.memory_space<vmem>>, vector<1x32xf32>
    %174 = vector.broadcast %173 : vector<1x32xf32> to vector<8x32xf32>
    %175 = arith.addf %172, %174 : vector<8x32xf32>
    %c0_135 = arith.constant 0 : index
    %c0_136 = arith.constant 0 : index
    %176 = vector.load %arg15[%c0_135, %c0_136] : memref<32x32xf32, #tpu.memory_space<vmem>>, vector<32x32xf32>
    %cst_137 = arith.constant dense<0.000000e+00> : vector<8x32xf32>
    %177 = tpu.matmul %175, %176, %cst_137 {dimension_numbers = #tpu.dot_dimension_numbers<[1], [0], [0], [1], [0, 0, 1, 1], [], []>} : vector<8x32xf32>, vector<32x32xf32>, vector<8x32xf32> -> vector<8x32xf32>
    %c0_138 = arith.constant 0 : index
    %c0_139 = arith.constant 0 : index
    %178 = vector.load %arg16[%c0_138, %c0_139] : memref<1x32xf32, #tpu.memory_space<vmem>>, vector<1x32xf32>
    %179 = vector.broadcast %178 : vector<1x32xf32> to vector<8x32xf32>
    %180 = arith.addf %177, %179 : vector<8x32xf32>
    %c0_140 = arith.constant 0 : index
    %c0_141 = arith.constant 0 : index
    %c0_142 = arith.constant 0 : index
    %181 = vector.load %arg17[%c0_140, %c0_141, %c0_142] : memref<1x8x32xf32, #tpu.memory_space<vmem>>, vector<1x8x32xf32>
    %182 = vector.shape_cast %181 : vector<1x8x32xf32> to vector<8x32xf32>
    %183 = vector.shape_cast %180 : vector<8x32xf32> to vector<1x8x32xf32>
    tpu.vector_store %arg17[%c0_140, %c0_141, %c0_142], %183 {strides = array<i32>} : memref<1x8x32xf32, #tpu.memory_space<vmem>>, vector<1x8x32xf32>,
    return
  }
  func.func @transform_0(%arg0: i32) -> (i32, i32, i32) {
    %c0_i32 = arith.constant 0 : i32
    %c0_i32_0 = arith.constant 0 : i32
    %c0_i32_1 = arith.constant 0 : i32
    return %arg0, %c0_i32, %c0_i32_0 : i32, i32, i32
  }
  func.func @transform_1(%arg0: i32) -> (i32, i32, i32) {
    %c0_i32 = arith.constant 0 : i32
    %c0_i32_0 = arith.constant 0 : i32
    %c0_i32_1 = arith.constant 0 : i32
    return %arg0, %c0_i32, %c0_i32_0 : i32, i32, i32
  }
  func.func @transform_2(%arg0: i32) -> (i32, i32, i32) {
    %c0_i32 = arith.constant 0 : i32
    %c0_i32_0 = arith.constant 0 : i32
    %c0_i32_1 = arith.constant 0 : i32
    %c0_i32_2 = arith.constant 0 : i32
    return %c0_i32, %c0_i32_0, %c0_i32_1 : i32, i32, i32
  }
  func.func @transform_3(%arg0: i32) -> (i32, i32, i32) {
    %c0_i32 = arith.constant 0 : i32
    %c0_i32_0 = arith.constant 0 : i32
    %c0_i32_1 = arith.constant 0 : i32
    %c0_i32_2 = arith.constant 0 : i32
    return %c0_i32, %c0_i32_0, %c0_i32_1 : i32, i32, i32
  }
  func.func @transform_4(%arg0: i32) -> (i32, i32, i32) {
    %c0_i32 = arith.constant 0 : i32
    %c0_i32_0 = arith.constant 0 : i32
    %c0_i32_1 = arith.constant 0 : i32
    %c0_i32_2 = arith.constant 0 : i32
    return %c0_i32, %c0_i32_0, %c0_i32_1 : i32, i32, i32
  }
  func.func @transform_5(%arg0: i32) -> (i32, i32, i32) {
    %c0_i32 = arith.constant 0 : i32
    %c0_i32_0 = arith.constant 0 : i32
    %c0_i32_1 = arith.constant 0 : i32
    %c0_i32_2 = arith.constant 0 : i32
    return %c0_i32, %c0_i32_0, %c0_i32_1 : i32, i32, i32
  }
  func.func @transform_6(%arg0: i32) -> (i32, i32, i32) {
    %c0_i32 = arith.constant 0 : i32
    %c0_i32_0 = arith.constant 0 : i32
    %c0_i32_1 = arith.constant 0 : i32
    %c0_i32_2 = arith.constant 0 : i32
    return %c0_i32, %c0_i32_0, %c0_i32_1 : i32, i32, i32
  }
  func.func @transform_7(%arg0: i32) -> (i32, i32, i32) {
    %c0_i32 = arith.constant 0 : i32
    %c0_i32_0 = arith.constant 0 : i32
    %c0_i32_1 = arith.constant 0 : i32
    %c0_i32_2 = arith.constant 0 : i32
    return %c0_i32, %c0_i32_0, %c0_i32_1 : i32, i32, i32
  }
  func.func @transform_8(%arg0: i32) -> (i32, i32, i32) {
    %c0_i32 = arith.constant 0 : i32
    %c0_i32_0 = arith.constant 0 : i32
    %c0_i32_1 = arith.constant 0 : i32
    %c0_i32_2 = arith.constant 0 : i32
    return %c0_i32, %c0_i32_0, %c0_i32_1 : i32, i32, i32
  }
  func.func @transform_9(%arg0: i32) -> (i32, i32) {
    %c0_i32 = arith.constant 0 : i32
    %c0_i32_0 = arith.constant 0 : i32
    %c0_i32_1 = arith.constant 0 : i32
    return %c0_i32, %c0_i32_0 : i32, i32
  }
  func.func @transform_10(%arg0: i32) -> (i32, i32) {
    %c0_i32 = arith.constant 0 : i32
    %c0_i32_0 = arith.constant 0 : i32
    %c0_i32_1 = arith.constant 0 : i32
    return %c0_i32, %c0_i32_0 : i32, i32
  }
  func.func @transform_11(%arg0: i32) -> (i32, i32) {
    %c0_i32 = arith.constant 0 : i32
    %c0_i32_0 = arith.constant 0 : i32
    %c0_i32_1 = arith.constant 0 : i32
    return %c0_i32, %c0_i32_0 : i32, i32
  }
  func.func @transform_12(%arg0: i32) -> (i32, i32) {
    %c0_i32 = arith.constant 0 : i32
    %c0_i32_0 = arith.constant 0 : i32
    %c0_i32_1 = arith.constant 0 : i32
    return %c0_i32, %c0_i32_0 : i32, i32
  }
  func.func @transform_13(%arg0: i32) -> (i32, i32) {
    %c0_i32 = arith.constant 0 : i32
    %c0_i32_0 = arith.constant 0 : i32
    %c0_i32_1 = arith.constant 0 : i32
    return %c0_i32, %c0_i32_0 : i32, i32
  }
  func.func @transform_14(%arg0: i32) -> (i32, i32) {
    %c0_i32 = arith.constant 0 : i32
    %c0_i32_0 = arith.constant 0 : i32
    %c0_i32_1 = arith.constant 0 : i32
    return %c0_i32, %c0_i32_0 : i32, i32
  }
  func.func @transform_15(%arg0: i32) -> (i32, i32) {
    %c0_i32 = arith.constant 0 : i32
    %c0_i32_0 = arith.constant 0 : i32
    %c0_i32_1 = arith.constant 0 : i32
    return %c0_i32, %c0_i32_0 : i32, i32
  }
  func.func @transform_16(%arg0: i32) -> (i32, i32, i32) {
    %c0_i32 = arith.constant 0 : i32
    %c0_i32_0 = arith.constant 0 : i32
    %c0_i32_1 = arith.constant 0 : i32
    return %arg0, %c0_i32, %c0_i32_0 : i32, i32, i32
  }
}

</mosaic_0001>

<bundles_post_ra>
// kernel: tpu_custom_call.1
= control target key start
LH: loop header
LB: loop body
LE: loop exit
PB: predicated region body
PF: predicated region fallthrough
CT: control target
= control target key end

     0   :  { %s2210_s0 = inlined_call_operand.vmem [shape: f32[2,8,32], index: 0, kind: input, shape index: {}]   ;;  %s2211_s1 = inlined_call_operand.vmem [shape: f32[2,16,32], index: 1, kind: input, shape index: {}]   ;;  %s2212_s2 = inlined_call_operand.vmem [shape: f32[4,32,8], index: 2, kind: input, shape index: {}]   ;;  %s2213_s3 = inlined_call_operand.vmem [shape: f32[4,1,8], index: 3, kind: input, shape index: {}]   ;;  %s2214_s4 = inlined_call_operand.vmem [shape: f32[4,32,8], index: 4, kind: input, shape index: {}]   ;;  %s2215_s5 = inlined_call_operand.vmem [shape: f32[4,1,8], index: 5, kind: input, shape index: {}]   ;;  %s2216_s6 = inlined_call_operand.vmem [shape: f32[4,32,8], index: 6, kind: input, shape index: {}]   ;;  %s2217_s7 = inlined_call_operand.vmem [shape: f32[4,1,8], index: 7, kind: input, shape index: {}]   ;;  %s2218_s8 = inlined_call_operand.vmem [shape: f32[4,8,32], index: 8, kind: input, shape index: {}]   ;;  %s2219_s9 = inlined_call_operand.vmem [shape: f32[1,32], index: 9, kind: input, shape index: {}]   ;;  %s2220_s10 = inlined_call_operand.vmem [shape: f32[32,32], index: 10, kind: input, shape index: {}]   ;;  %s2221_s11 = inlined_call_operand.vmem [shape: f32[1,32], index: 11, kind: input, shape index: {}]   ;;  %s2222_s12 = inlined_call_operand.vmem [shape: f32[32,32], index: 12, kind: input, shape index: {}]   ;;  %s2223_s13 = inlined_call_operand.vmem [shape: f32[1,32], index: 13, kind: input, shape index: {}]   ;;  %s2224_s14 = inlined_call_operand.vmem [shape: f32[32,32], index: 14, kind: input, shape index: {}]   ;;  %s2225_s15 = inlined_call_operand.vmem [shape: f32[1,32], index: 15, kind: input, shape index: {}]   ;;  %s2226_s16 = inlined_call_operand.hbm [shape: f32[2,8,32], index: 16, kind: output, shape index: {}]  }
   0x1   :  { %2235 = sst [smem:[#allocation12_spill]] %s2210_s0 }
   0x2   :  { %2236 = sst [smem:[#allocation13_spill]] %s2211_s1 }
   0x3   :  { %2237 = sst [smem:[#allocation14_spill]] %s2225_s15 }
   0x4   :  { %21 = vsyncpa [#allocation3], 0 }
   0x5   :  { %23 = vsyncpa [#allocation3 + $0x1], 0  ;;  %s1798_s21 = smov 0   ;;  %s1800_s22 = smov 0  }
   0x6   :  { %s1802_s23 = smov 0   ;;  %s1804_s24 = smov 0  }
   0x7 LB: > { %2238 = sst [smem:[#allocation5_spill]] %s1699_s21  ;;  %s1819_s25 = sadd.s32 4294967295, %s1711_s24   ;;  %s1711_s24 = sphi %s1804_s24, %s2254_s24   ;;  %s1707_s23 = sphi %s1802_s23, %s2256_s23   ;;  %s1703_s22 = sphi %s1800_s22, %s2258_s22   ;;  %s1699_s21 = sphi %s1798_s21, %s2257_s21  }
   0x8   : > { %2239 = sst [smem:[#allocation6_spill]] %s1707_s23  ;;  %s1474_s26 = sadd.s32 4294967294, %s1711_s24  }
   0x9   : > { %2240 = sst [smem:[#allocation7_spill]] %s1711_s24  ;;  %s1823_s27 = sadd.s32 1, %s1711_s24  }
   0xa   : > { %2241 = sst [smem:[#allocation8_spill]] %s1823_s27  ;;  %s382_s28 = sadd.s32 1, %s1707_s23 }
   0xb   : > { %s379_s29 = ssub.s32 %s1711_s24, %s1823_s27  ;;  %p392_p0 = scmp.ne.s32.totalorder %s1707_s23, %s1703_s22 }
   0xc   : > { %p380_p1 = scmp.eq.s32.totalorder %s379_s29, 0  ;;  %p393_p2 = scmp.eq.s32.totalorder %s1819_s25, 1 }
   0xd   : > { %p398_p3 = scmp.ne.s32.totalorder %s1703_s22, %s1699_s21  ;;  %p399_p4 = scmp.eq.s32.totalorder %s1474_s26, 1 }
   0xe   : > { %s1834_s30 = scalar_select %p380_p1, %s1707_s23, %s382_s28  }
   0xf   : > { %p1836_p5 = por %p393_p2, %p392_p0  ;;  %p1840_p6 = por %p399_p4, %p398_p3 }
  0x10   : > { %2242 = sst [smem:[#allocation9_spill]] %s1834_s30  ;;  %p1477_p7 = scmp.ge.s32.totalorder %s1711_s24, 1 }
  0x11   : > { %s2243_s0 = scalar_select %p1836_p5, 1, 0 }
  0x12   : > { %s2245_s17 = scalar_select %p1840_p6, 1, 0 }
  0x13   : > { %2244 = sst [smem:[#allocation10_spill]] %s2243_s0  ;;  %p474_p8 = scmp.lt.s32.totalorder %s1711_s24, 3 }
  0x14   : > { %2246 = sst [smem:[#allocation11_spill]] %s2245_s17 }
  0x15   : > { %p475_p9 = pnand %p1477_p7, %p474_p8 }
  0x16   : > { %p528_p10 = scmp.lt.s32.totalorder (!%p475_p9), %s1819_s25, 1  ;;  %s2247_s1 = sld [smem:[#allocation13_spill]] (!%p475_p9) }
  0x17   : > { %478 = sbr.rel (%p475_p9) target bundleno = 2691 (0xa83), region = 84  ;;  %s2248_s15 = sld [smem:[#allocation12_spill]] (!%p475_p9) }
  0x18   : > { %s525_s24 = sand.u32 (!%p475_p9), 1, %s1703_s22   ;;  %s2250_s17 = sld [smem:[#allocation14_spill]] (!%p475_p9) }
  0x19   : > { %s1388_s21 = scalar_lea.sflag (!%p475_p9), [#allocation3], %s525_s24 }
  0x1c   : > { %v575_v0 = vld [vmem:[%s2214_s4 + $0x18] sm:$0xff]  ;;  %v574_v1 = vld [vmem:[%s2214_s4 + $0x10] sm:$0xff]  ;;  %v573_v2 = vld [vmem:[%s2214_s4 + $0x8] sm:$0xff]  ;;  %s529_s20 = scalar_select %p528_p10, %s1819_s25, 1  ;;  %vm548_vm0 = vcmask 261120   ;;  %vm640_vm1 = vcmask 64512  }
  0x1d   : > { %598 = vmatpush.msra.mxu1 %v575_v0  ;;  %v543_v3 = vld [vmem:[%s2212_s2 + $0x18] sm:$0xff]  ;;  %v542_v4 = vld [vmem:[%s2212_s2 + $0x10] sm:$0xff]  ;;  %v572_v5 = vld [vmem:[%s2214_s4] sm:$0xff]  ;;  %vm671_vm2 = vcmask 130048  }
  0x1e   : > { %564 = vmatpush.msra.mxu0 %v543_v3  ;;  %v541_v6 = vld [vmem:[%s2212_s2 + $0x8] sm:$0xff]  ;;  %v540_v7 = vld [vmem:[%s2212_s2] sm:$0xff]  ;;  %s1577_s23 = sshll.u32 %s529_s20, 4  ;;  %s1479_s27 = sshll.u32 %s529_s20, 3  ;;  %v612_v19 = vld [vmem:[%s2216_s6 + $0x18] sm:$0xff] }
  0x1f   : > { %599 = vmatpush.msra.mxu1 %v574_v1  ;;  %s536_s18 = scalar_lea.vmem %s2247_s1, %s1577_s23  ;;  %s531_s0 = scalar_lea.vmem %s2248_s15, %s1479_s27  ;;  %v1617_v12 = vld [vmem:[%s2215_s5] ss:$0 sm:$0xff]  ;;  %v611_v20 = vld [vmem:[%s2216_s6 + $0x10] sm:$0xff]  ;;  %629 = vmatpush.msra.mxu2 %v612_v19  ;;  %v610_v21 = vld [vmem:[%s2216_s6 + $0x8] sm:$0xff] }
  0x20   : > { %565 = vmatpush.msra.mxu0 %v542_v4  ;;  %v1878_v8 = vld [vmem:[%s536_s18] sm:$0xff]  ;;  %v1886_v10 = vld [vmem:[%s536_s18 + $0x8] sm:$0xff]  ;;  %v1500_v36 = vld [vmem:[%s2214_s4 + $0x38] sm:$0xff]  ;;  %s1574_s20 = sshll.u32 %s1819_s25, 3 }
  0x21   : > { %600 = vmatpush.msra.mxu1 %v573_v2  ;;  %v1880_v9 = vld [vmem:[%s531_s0] sm:$0xff]  ;;  %630 = vmatpush.msra.mxu2 %v611_v20  ;;  %v1499_v37 = vld [vmem:[%s2214_s4 + $0x30] sm:$0xff]  ;;  %v1498_v38 = vld [vmem:[%s2214_s4 + $0x28] sm:$0xff]  ;;  %s1478_s0 = sshll.u32 %s525_s24, 3  ;;  %s1398_s23 = scalar_lea.hbm %s2226_s16, %s1574_s20 }
  0x22   : > { %566 = vmatpush.msra.mxu0 %v541_v6  ;;  %v1618_v15 = vld [vmem:[%s2213_s3] ss:$0 sm:$0xff]  ;;  %v1494_v40 = vld [vmem:[%s2212_s2 + $0x38] sm:$0xff]  ;;  %v1493_v41 = vld [vmem:[%s2212_s2 + $0x30] sm:$0xff]  ;;  %s527_s18 = scalar_lea.vmem [#allocation2], %s1478_s0  ;;  %s1402_s15 = sshll.u32 %s1398_s23, 4  ;;  %s1403_s15 = int_to_ptr.hbm [resolvable:$true] %s1402_s15 }
  0x23   : > { %601 = vmatpush.msra.mxu1 %v572_v5  ;;  %v609_v22 = vld [vmem:[%s2216_s6] sm:$0xff]  ;;  %631 = vmatpush.msra.mxu2 %v610_v21  ;;  %v1492_v42 = vld [vmem:[%s2212_s2 + $0x28] sm:$0xff]  ;;  %v1507_v56 = vld [vmem:[%s2216_s6 + $0x38] sm:$0xff]  ;;  %s1400_s19 = sshll.u32 %s527_s18, 4  ;;  %s1663_s25 = sshra.s32 %s1403_s15, 4  ;;  %s1401_s19 = int_to_ptr.vmem [resolvable:$true] %s1400_s19  ;;  %s1664_s25 = int_to_ptr.hbm [resolvable:$true] %s1663_s25 }
  0x24   : > { %1483 = vmatmul.msk.f32.vlgmr.msra.gmra.mxu1 %vm548_vm0, %v1878_v8  ;;  %567 = vmatpush.msra.mxu0 %v540_v7  ;;  %v1619_v27 = vld [vmem:[%s2217_s7] ss:$0 sm:$0xff]  ;;  %v1620_v49 = vld [vmem:[%s2215_s5 + $0x1] ss:$0 sm:$0xff]  ;;  %v1506_v57 = vld [vmem:[%s2216_s6 + $0x30] sm:$0xff]  ;;  %s1665_s1 = scalar_lea.hbm %s1664_s25, 8  ;;  %p1670_p0 = scmp.lt.s32.totalorder %s1664_s25, %s2226_s16 }
  0x25   : > { %1482 = vmatmul.msk.f32.vlgmr.msra.gmra.mxu0 %vm548_vm0, %v1880_v9  ;;  %632 = vmatpush.msra.mxu2 %v609_v22  ;;  %v1497_v39 = vld [vmem:[%s2214_s4 + $0x20] sm:$0xff]  ;;  %v1505_v58 = vld [vmem:[%s2216_s6 + $0x28] sm:$0xff]  ;;  %v1527_v60 = vld [vmem:[%s2214_s4 + $0x58] sm:$0xff]  ;;  %p1666_p11 = scmp.ne.s32.totalorder %s1664_s25, %s1665_s1  ;;  %s1669_s0 = scalar_lea.hbm %s2226_s16, 16 }
  0x26   : > { %1485 = vmatmul.msk.f32.vlgmr.msra.gmra.mxu2 %vm548_vm0, %v1878_v8  ;;  %v1491_v43 = vld [vmem:[%s2212_s2 + $0x20] sm:$0xff]  ;;  %792 = vmatpush.msrb.mxu1 %v1507_v56  ;;  %v1526_v0 = vld [vmem:[%s2214_s4 + $0x50] sm:$0xff]  ;;  %v1525_v1 = vld [vmem:[%s2214_s4 + $0x48] sm:$0xff]  ;;  %p1671_p1 = scmp.lt.s32.totalorder %s1669_s0, %s1665_s1 }
  0x27   : > { %v1621_v52 = vld [vmem:[%s2213_s3 + $0x1] ss:$0 sm:$0xff]  ;;  %v1521_v3 = vld [vmem:[%s2212_s2 + $0x58] sm:$0xff]  ;;  %v1520_v4 = vld [vmem:[%s2212_s2 + $0x50] sm:$0xff]  ;;  %p1667_p12 = pnand %p1666_p11, %p1836_p5 }
  0x28   : > { %793 = vmatpush.msrb.mxu1 %v1506_v57  ;;  %v1504_v59 = vld [vmem:[%s2216_s6 + $0x20] sm:$0xff]  ;;  %v1519_v5 = vld [vmem:[%s2212_s2 + $0x48] sm:$0xff]  ;;  %v1547_v57 = vld [vmem:[%s2212_s2 + $0x78] sm:$0xff]  ;;  %p1672_p2 = por %p1671_p1, %p1670_p0 }
  0x29   : > { %v1524_v2 = vld [vmem:[%s2214_s4 + $0x40] sm:$0xff]  ;;  %p1668_p13 = pneg %p1667_p12 }
  0x2a   : > { %794 = vmatpush.msrb.mxu1 %v1505_v58  ;;  %v1518_v6 = vld [vmem:[%s2212_s2 + $0x40] sm:$0xff]  ;;  %v1546_v58 = vld [vmem:[%s2212_s2 + $0x70] sm:$0xff] }
  0x2b   : > { %v706_v20 = vld [vmem:[%s2218_s8] sm:$0xff]  ;;  %p1673_p3 = pnand %p1672_p2, %p1668_p13 }
  0x2c   : > { %1484 = vmatmul.msk.f32.gmra.mxu1 %vm548_vm0, %v1886_v10 }
  0x2d   : > { %795 = vmatpush.msrb.mxu1 %v1504_v59  ;;  %v1545_v59 = vld [vmem:[%s2212_s2 + $0x68] sm:$0xff] }
  0x2e   : > { %1486 = vmatmul.msk.f32.gmra.mxu2 %vm548_vm0, %v1886_v10 }
  0x2f   : > { %967 = vmatpush.msra.mxu1 %v1527_v60  ;;  %v1544_v60 = vld [vmem:[%s2212_s2 + $0x60] sm:$0xff] }
  0x31   : > { %968 = vmatpush.msra.mxu1 %v1526_v0 }
  0x33   : > { %969 = vmatpush.msra.mxu1 %v1525_v1 }
  0x34   : > { %1509 = vmatmul.msk.f32.vlgmr.msrb.gmra.mxu1 %vm548_vm0, %v1878_v8 }
  0x35   : > { %970 = vmatpush.msra.mxu1 %v1524_v2 }
  0x3c   : > { %1510 = vmatmul.msk.f32.gmra.mxu1 %vm548_vm0, %v1886_v10 }
  0x44   : > { %1529 = vmatmul.msk.f32.vlgmr.msra.gmra.mxu1 %vm548_vm0, %v1878_v8 }
  0x4c   : > { %1530 = vmatmul.msk.f32.gmra.mxu1 %vm548_vm0, %v1886_v10 }
  0xa1   : > { %v603_v11 = vpop.f32.mrf.mxu1 }
  0xa2   : > { %v569_v16 = vpop.f32.mrf.mxu0  ;;  %v604_v17 = vadd.f32 %v1617_v12, %v603_v11  ;;  %v1622_v11 = vld [vmem:[%s2217_s7 + $0x1] ss:$0 sm:$0xff] }
  0xa3   : > { %v570_v18 = vadd.f32 %v1618_v15, %v569_v16 }
  0xa9   : > { %v606_v13 = vpop.f32.mrf.mxu1  ;;  %v634_v26 = vpop.f32.mrf.mxu2 }
  0xaa   : > { %v607_v14 = vadd.f32 %v1617_v12, %v606_v13  ;;  %v635_v31 = vadd.f32 %v1619_v27, %v634_v26 }
  0xac   : > { %1487 = vmatpush.xpose.msk.msra.mxu3 %vm640_vm1, %v607_v14 }
  0xb0   : > { %1488 = vmatpush.xpose.msk.msra.mxu3 %vm640_vm1, %v604_v17 }
  0xb1   : > { %v637_v29 = vpop.f32.mrf.mxu2  ;;  %v797_v7 = vpop.f32.mrf.mxu1 }
  0xb2   : > { %v638_v32 = vadd.f32 %v1619_v27, %v637_v29  ;;  %v798_v13 = vadd.f32 %v1622_v11, %v797_v7  ;;  %v1624_v29 = vld [vmem:[%s2213_s3 + $0x2] ss:$0 sm:$0xff]  ;;  %v1627_v7 = vld [vmem:[%s2213_s3 + $0x3] ss:$0 sm:$0xff] }
  0xb3   : > { %1489 = vmatmul.msk.f32.vlgmr.msra.gmra.mxu3 %vm640_vm1, %v570_v18 }
  0xb4   : > { %700 = vmatpush.msrb.mxu0 %v638_v32  ;;  %729 = vmatpush.msrb.mxu3 %v1494_v40  ;;  %v1515_v32 = vld [vmem:[%s2218_s8 + $0x8] sm:$0xff] }
  0xb6   : > { %701 = vmatpush.msrb.mxu0 %v635_v31  ;;  %730 = vmatpush.msrb.mxu3 %v1493_v41 }
  0xb8   : > { %759 = vmatpush.msra.mxu0 %v1500_v36  ;;  %731 = vmatpush.msrb.mxu3 %v1492_v42  ;;  %v1531_v36 = vld [vmem:[%s2216_s6 + $0x40] sm:$0xff]  ;;  %v1553_v42 = vld [vmem:[%s2214_s4 + $0x78] sm:$0xff] }
  0xb9   : > { %v800_v12 = vpop.f32.mrf.mxu1  ;;  %1153 = vmatpush.msrb.mxu1 %v1553_v42 }
  0xba   : > { %760 = vmatpush.msra.mxu0 %v1499_v37  ;;  %732 = vmatpush.msrb.mxu3 %v1491_v43  ;;  %v801_v14 = vadd.f32 %v1622_v11, %v800_v12  ;;  %v1552_v43 = vld [vmem:[%s2214_s4 + $0x70] sm:$0xff] }
  0xbb   : > { %1496 = vmatmul.msk.f32.vlgmr.msrb.gmra.mxu3 %vm548_vm0, %v1880_v9  ;;  %1154 = vmatpush.msrb.mxu1 %v1552_v43 }
  0xbc   : > { %761 = vmatpush.msra.mxu0 %v1498_v38  ;;  %861 = vmatpush.msra.mxu3 %v801_v14  ;;  %v1559_v14 = vld [vmem:[%s2216_s6 + $0x70] sm:$0xff] }
  0xbe   : > { %762 = vmatpush.msra.mxu0 %v1497_v39  ;;  %862 = vmatpush.msra.mxu3 %v798_v13  ;;  %v1560_v13 = vld [vmem:[%s2216_s6 + $0x78] sm:$0xff] }
  0xc0   : > { %910 = vmatpush.msrb.mxu3 %v706_v20 }
  0xc1   : > { %v972_v21 = vpop.f32.mrf.mxu1 }
 0x136   : > { %v667_v23 = vpop.f32.mrf.mxu3 }
 0x137   : > { %v670_v24 = vmul.f32 0.35355338, %v667_v23  ;;  %v1623_v23 = vld [vmem:[%s2215_s5 + $0x2] ss:$0 sm:$0xff] }
 0x139   : > { %v672_v25 = vsel %vm671_vm2, %v670_v24, -inf }
 0x13a   : > { %673 = vmax.xlane.f32.xlu0 %v672_v25 }
 0x13e   : > { %v734_v53 = vpop.f32.mrf.mxu3 }
 0x13f   : > { %v735_v55 = vadd.f32 %v1621_v52, %v734_v53 }
 0x1ad   : > { %v674_v28 = vpop.xlane.xlu0 %673 }
 0x1ae   : > { %v675_v30 = vsub.f32 %v670_v24, %v674_v28  ;;  %v975_v24 = vpop.f32.mrf.mxu1  ;;  %v973_v28 = vadd.f32 %v1623_v23, %v972_v21 }
 0x1af   : > { %v976_v26 = vadd.f32 %v1623_v23, %v975_v24  ;;  %v1628_v23 = vld [vmem:[%s2217_s7 + $0x3] ss:$0 sm:$0xff] }
 0x1b0   : > { %v676_v33 = vmul.f32 1.442695, %v675_v30 }
 0x1b2   : > { %1633 = vpow2.f32 %v676_v33  ;;  %v1534_v33 = vld [vmem:[%s2216_s6 + $0x58] sm:$0xff] }
 0x1b8   : > { %v1634_v34 = vpop.eup %1633 }
 0x1b9   : > { %v678_v35 = vsel %vm671_vm2, %v1634_v34, 0.0 }
 0x1ba   : > { %679 = vadd.xlane.f32.xlu0 %v678_v35  ;;  %v1532_v35 = vld [vmem:[%s2216_s6 + $0x48] sm:$0xff] }
 0x22d   : > { %v680_v44 = vpop.xlane.xlu0 %679 }
 0x22e   : > { %1635 = vrcp.f32 %v680_v44  ;;  %v1551_v44 = vld [vmem:[%s2214_s4 + $0x68] sm:$0xff] }
 0x22f   : > { %1155 = vmatpush.msrb.mxu1 %v1551_v44  ;;  %v1326_v44 = vld [vmem:[%s2222_s12 + $0x10] sm:$0xff] }
 0x234   : > { %v1636_v45 = vpop.eup %1635 }
 0x235   : > { %v682_v46 = vmul.f32 %v1636_v45, %v1634_v34  ;;  %v1533_v34 = vld [vmem:[%s2216_s6 + $0x50] sm:$0xff]  ;;  %v1550_v45 = vld [vmem:[%s2214_s4 + $0x60] sm:$0xff] }
 0x236   : > { %1156 = vmatpush.msrb.mxu1 %v1550_v45  ;;  %v1325_v45 = vld [vmem:[%s2222_s12 + $0x8] sm:$0xff] }
 0x237   : > { %1490 = vmatmul.msk.f32.vlgmr.msrb.gmra.mxu0 %vm671_vm2, %v682_v46  ;;  %1555 = vmatmul.msk.f32.vlgmr.msrb.gmra.mxu1 %vm548_vm0, %v1878_v8 }
 0x238   : > { %937 = vmatpush.msrb.mxu0 %v1521_v3 }
 0x23a   : > { %938 = vmatpush.msrb.mxu0 %v1520_v4 }
 0x23c   : > { %939 = vmatpush.msrb.mxu0 %v1519_v5 }
 0x23e   : > { %940 = vmatpush.msrb.mxu0 %v1518_v6 }
 0x23f   : > { %1502 = vmatmul.msk.f32.vlgmr.msra.gmra.mxu0 %vm548_vm0, %v1878_v8  ;;  %1556 = vmatmul.msk.f32.gmra.mxu1 %vm548_vm0, %v1886_v10 }
 0x247   : > { %1503 = vmatmul.msk.f32.gmra.mxu0 %vm548_vm0, %v1886_v10 }
 0x24f   : > { %1523 = vmatmul.msk.f32.vlgmr.msrb.gmra.mxu0 %vm548_vm0, %v1880_v9 }
 0x2b4   : > { %v1951_v47 = vpop.f32.mrf.mxu0 }
 0x2bc   : > { %v764_v48 = vpop.f32.mrf.mxu0 }
 0x2bd   : > { %v765_v54 = vadd.f32 %v1620_v49, %v764_v48 }
 0x2c4   : > { %v767_v50 = vpop.f32.mrf.mxu0 }
 0x2c5   : > { %v768_v51 = vadd.f32 %v1620_v49, %v767_v50 }
 0x2c7   : > { %1511 = vmatpush.xpose.msk.msrb.mxu2 %vm640_vm1, %v768_v51  ;;  %v1625_v51 = vld [vmem:[%s2217_s7 + $0x2] ss:$0 sm:$0xff] }
 0x2cb   : > { %1512 = vmatpush.xpose.msk.msrb.mxu2 %vm640_vm1, %v765_v54 }
 0x2cc   : > { %v942_v30 = vpop.f32.mrf.mxu0 }
 0x2cd   : > { %v943_v31 = vadd.f32 %v1624_v29, %v942_v30 }
 0x2ce   : > { %1513 = vmatmul.msk.f32.vlgmr.msrb.gmra.mxu2 %vm640_vm1, %v735_v55 }
 0x2cf   : > { %887 = vmatpush.msra.mxu2 %v1515_v32 }
 0x2d1   : > { %1000 = vmatpush.msrb.mxu2 %v1534_v33  ;;  %v1568_v33 = vld [vmem:[%s2218_s8 + $0x18] sm:$0xff] }
 0x2d3   : > { %1001 = vmatpush.msrb.mxu2 %v1533_v34  ;;  %v1295_v34 = vld [vmem:[%s2220_s10 + $0x18] sm:$0xff] }
 0x2d5   : > { %1002 = vmatpush.msrb.mxu2 %v1532_v35 }
 0x2d7   : > { %1003 = vmatpush.msrb.mxu2 %v1531_v36  ;;  %v1294_v36 = vld [vmem:[%s2220_s10 + $0x10] sm:$0xff] }
 0x351   : > { %v829_v61 = vpop.f32.mrf.mxu2 }
 0x352   : > { %v832_v62 = vmul.f32 0.35355338, %v829_v61  ;;  %v1158_v61 = vpop.f32.mrf.mxu1 }
 0x354   : > { %v833_v63 = vsel %vm671_vm2, %v832_v62, -inf }
 0x355   : > { %834 = vmax.xlane.f32.xlu1 %v833_v63  ;;  %v1626_v63 = vld [vmem:[%s2215_s5 + $0x3] ss:$0 sm:$0xff] }
 0x356   : > { %v1159_v2 = vadd.f32 %v1626_v63, %v1158_v61 }
 0x35a   : > { %v1161_v0 = vpop.f32.mrf.mxu1 }
 0x35b   : > { %v1162_v1 = vadd.f32 %v1626_v63, %v1161_v0 }
 0x3c8   : > { %v835_v15 = vpop.xlane.xlu1 %834 }
 0x3c9   : > { %v836_v16 = vsub.f32 %v832_v62, %v835_v15  ;;  %v1542_v62 = vld [vmem:[%s2218_s8 + $0x10] sm:$0xff]  ;;  %v1557_v15 = vld [vmem:[%s2216_s6 + $0x60] sm:$0xff] }
 0x3cb   : > { %v837_v17 = vmul.f32 1.442695, %v836_v16 }
 0x3cd   : > { %1637 = vpow2.f32 %v837_v17 }
 0x3d3   : > { %v1638_v18 = vpop.eup %1637 }
 0x3d4   : > { %v839_v19 = vsel %vm671_vm2, %v1638_v18, 0.0 }
 0x3d5   : > { %840 = vadd.xlane.f32.xlu1 %v839_v19 }
 0x448   : > { %v841_v22 = vpop.xlane.xlu1 %840 }
 0x449   : > { %1639 = vrcp.f32 %v841_v22 }
 0x44f   : > { %v1640_v25 = vpop.eup %1639 }
 0x450   : > { %v843_v27 = vmul.f32 %v1640_v25, %v1638_v18 }
 0x452   : > { %1514 = vmatmul.msk.f32.vlgmr.msra.gmra.mxu3 %vm671_vm2, %v843_v27 }
 0x453   : > { %1538 = vmatpush.xpose.msk.msra.mxu3 %vm640_vm1, %v976_v26 }
 0x457   : > { %1539 = vmatpush.xpose.msk.msra.mxu3 %vm640_vm1, %v973_v28 }
 0x45a   : > { %1517 = vmatmul.msk.f32.vlgmr.msrb.gmra.mxu3 %vm640_vm1, %v1951_v47 }
 0x45b   : > { %1095 = vmatpush.msrb.mxu3 %v1542_v62 }
 0x462   : > { %1540 = vmatmul.msk.f32.vlgmr.msra.gmra.mxu3 %vm640_vm1, %v943_v31 }
 0x463   : > { %1564 = vmatpush.xpose.msk.msra.mxu3 %vm640_vm1, %v1162_v1 }
 0x467   : > { %1565 = vmatpush.xpose.msk.msra.mxu3 %vm640_vm1, %v1159_v2 }
 0x4d5   : > { %v864_v37 = vpop.f32.mrf.mxu3 }
 0x4d6   : > { %1516 = vmatmul.msk.f32.vlgmr.msra.gmra.mxu2 %vm640_vm1, %v864_v37  ;;  %v1293_v37 = vld [vmem:[%s2220_s10 + $0x8] sm:$0xff] }
 0x4d7   : > { %1186 = vmatpush.msra.mxu2 %v1560_v13 }
 0x4d9   : > { %1187 = vmatpush.msra.mxu2 %v1559_v14 }
 0x4dd   : > { %v2044_v38 = vpop.f32.mrf.mxu3 }
 0x4de   : > { %1536 = vmatmul.msk.f32.vlgmr.msrb.gmra.mxu2 %vm548_vm0, %v1878_v8 }
 0x4e5   : > { %v1037_v39 = vpop.f32.mrf.mxu3 }
 0x4e6   : > { %v1040_v40 = vmul.f32 0.35355338, %v1037_v39  ;;  %1537 = vmatmul.msk.f32.gmra.mxu2 %vm548_vm0, %v1886_v10  ;;  %v1327_v39 = vld [vmem:[%s2222_s12 + $0x18] sm:$0xff] }
 0x4e7   : > { %1347 = vmatpush.msra.mxu1 %v1327_v39 }
 0x4e8   : > { %v1041_v41 = vsel %vm671_vm2, %v1040_v40, -inf }
 0x4e9   : > { %1042 = vmax.xlane.f32.xlu2 %v1041_v41  ;;  %1348 = vmatpush.msra.mxu1 %v1326_v44 }
 0x4eb   : > { %1349 = vmatpush.msra.mxu1 %v1325_v45 }
 0x559   : > { %v889_v46 = vpop.f32.mrf.mxu2 }
 0x55a   : > { %v913_v16 = vadd.f32 %v2044_v38, %v889_v46  ;;  %v1292_v38 = vld [vmem:[%s2220_s10] sm:$0xff] }
 0x55b   : > { %v1324_v46 = vld [vmem:[%s2222_s12] sm:$0xff] }
 0x55c   : > { %v1043_v47 = vpop.xlane.xlu2 %1042  ;;  %1350 = vmatpush.msra.mxu1 %v1324_v46 }
 0x55d   : > { %v1044_v48 = vsub.f32 %v1040_v40, %v1043_v47  ;;  %v1629_v40 = vld [vmem:[%s2219_s9] ss:$0 sm:$0xff]  ;;  %v1358_v47 = vld [vmem:[%s2224_s14 + $0x18] sm:$0xff] }
 0x55f   : > { %v1045_v49 = vmul.f32 1.442695, %v1044_v48  ;;  %v1357_v48 = vld [vmem:[%s2224_s14 + $0x10] sm:$0xff] }
 0x561   : > { %1641 = vpow2.f32 %v1045_v49  ;;  %v1005_v50 = vpop.f32.mrf.mxu2  ;;  %v1630_v49 = vld [vmem:[%s2221_s11] ss:$0 sm:$0xff] }
 0x562   : > { %v1006_v55 = vadd.f32 %v1625_v51, %v1005_v50 }
 0x567   : > { %v1642_v52 = vpop.eup %1641 }
 0x568   : > { %v1047_v53 = vsel %vm671_vm2, %v1642_v52, 0.0 }
 0x569   : > { %1048 = vadd.xlane.f32.xlu2 %v1047_v53  ;;  %v1008_v54 = vpop.f32.mrf.mxu2  ;;  %v1356_v53 = vld [vmem:[%s2224_s14 + $0x8] sm:$0xff] }
 0x56a   : > { %v1009_v56 = vadd.f32 %v1625_v51, %v1008_v54  ;;  %v1355_v54 = vld [vmem:[%s2224_s14] sm:$0xff] }
 0x56c   : > { %1069 = vmatpush.msra.mxu0 %v1009_v56 }
 0x56e   : > { %1070 = vmatpush.msra.mxu0 %v1006_v55  ;;  %v1631_v55 = vld [vmem:[%s2223_s13] ss:$0 sm:$0xff] }
 0x570   : > { %1123 = vmatpush.msrb.mxu0 %v1547_v57 }
 0x572   : > { %1124 = vmatpush.msrb.mxu0 %v1546_v58  ;;  %v1632_v58 = vld [vmem:[%s2250_s17] ss:$0 sm:$0xff] }
 0x574   : > { %1125 = vmatpush.msrb.mxu0 %v1545_v59 }
 0x576   : > { %1126 = vmatpush.msrb.mxu0 %v1544_v60 }
 0x5dc   : > { %v1049_v3 = vpop.xlane.xlu2 %1048 }
 0x5dd   : > { %1643 = vrcp.f32 %v1049_v3 }
 0x5e3   : > { %v1644_v4 = vpop.eup %1643 }
 0x5e4   : > { %v1051_v5 = vmul.f32 %v1644_v4, %v1642_v52 }
 0x5e6   : > { %1541 = vmatmul.msk.f32.vlgmr.msra.gmra.mxu0 %vm671_vm2, %v1051_v5 }
 0x5ee   : > { %1549 = vmatmul.msk.f32.vlgmr.msrb.gmra.mxu0 %vm548_vm0, %v1880_v9  ;;  %v1558_v9 = vld [vmem:[%s2216_s6 + $0x68] sm:$0xff] }
 0x5ef   : > { %1188 = vmatpush.msra.mxu2 %v1558_v9 }
 0x5f1   : > { %1189 = vmatpush.msra.mxu2 %v1557_v15 }
 0x5f2   : > { %1562 = vmatmul.msk.f32.vlgmr.msra.gmra.mxu2 %vm548_vm0, %v1878_v8 }
 0x5f3   : > { %1378 = vmatpush.msrb.mxu2 %v1358_v47 }
 0x5f5   : > { %1379 = vmatpush.msrb.mxu2 %v1357_v48 }
 0x5f7   : > { %1380 = vmatpush.msrb.mxu2 %v1356_v53 }
 0x5f9   : > { %1381 = vmatpush.msrb.mxu2 %v1355_v54 }
 0x5fa   : > { %1563 = vmatmul.msk.f32.gmra.mxu2 %vm548_vm0, %v1886_v10 }
 0x663   : > { %v1072_v6 = vpop.f32.mrf.mxu0 }
 0x664   : > { %1543 = vmatmul.msk.f32.vlgmr.msrb.gmra.mxu3 %vm640_vm1, %v1072_v6 }
 0x665   : > { %1281 = vmatpush.msrb.mxu3 %v1568_v33 }
 0x66b   : > { %v1128_v11 = vpop.f32.mrf.mxu0 }
 0x66c   : > { %v1129_v12 = vadd.f32 %v1627_v7, %v1128_v11 }
 0x66e   : > { %1566 = vmatmul.msk.f32.vlgmr.msra.gmra.mxu3 %vm640_vm1, %v1129_v12 }
 0x675   : > { %v1191_v22 = vpop.f32.mrf.mxu2 }
 0x676   : > { %v1192_v26 = vadd.f32 %v1628_v23, %v1191_v22 }
 0x67d   : > { %v1194_v25 = vpop.f32.mrf.mxu2 }
 0x67e   : > { %v1195_v27 = vadd.f32 %v1628_v23, %v1194_v25 }
 0x680   : > { %1255 = vmatpush.msra.mxu0 %v1195_v27 }
 0x682   : > { %1256 = vmatpush.msra.mxu0 %v1192_v26 }
 0x684   : > { %1315 = vmatpush.msrb.mxu0 %v1295_v34 }
 0x686   : > { %1316 = vmatpush.msrb.mxu0 %v1294_v36 }
 0x688   : > { %1317 = vmatpush.msrb.mxu0 %v1293_v37 }
 0x68a   : > { %1318 = vmatpush.msrb.mxu0 %v1292_v38 }
 0x6e7   : > { %v1097_v17 = vpop.f32.mrf.mxu3 }
 0x6e8   : > { %v1100_v18 = vadd.f32 %v1097_v17, %v913_v16 }
 0x6f1   : > { %v1223_v19 = vpop.f32.mrf.mxu3 }
 0x6f2   : > { %v1226_v20 = vmul.f32 0.35355338, %v1223_v19 }
 0x6f4   : > { %v1227_v21 = vsel %vm671_vm2, %v1226_v20, -inf }
 0x6f5   : > { %1228 = vmax.xlane.f32.xlu0 %v1227_v21 }
 0x768   : > { %v1229_v24 = vpop.xlane.xlu0 %1228 }
 0x769   : > { %v1230_v8 = vsub.f32 %v1226_v20, %v1229_v24 }
 0x76b   : > { %v1231_v10 = vmul.f32 1.442695, %v1230_v8 }
 0x76d   : > { %1645 = vpow2.f32 %v1231_v10 }
 0x773   : > { %v1646_v28 = vpop.eup %1645 }
 0x774   : > { %v1233_v29 = vsel %vm671_vm2, %v1646_v28, 0.0 }
 0x775   : > { %1234 = vadd.xlane.f32.xlu1 %v1233_v29 }
 0x7e8   : > { %v1235_v30 = vpop.xlane.xlu1 %1234 }
 0x7e9   : > { %1647 = vrcp.f32 %v1235_v30 }
 0x7ef   : > { %v1648_v31 = vpop.eup %1647 }
 0x7f0   : > { %v1237_v32 = vmul.f32 %v1648_v31, %v1646_v28 }
 0x7f2   : > { %1567 = vmatmul.msk.f32.vlgmr.msra.gmra.mxu0 %vm671_vm2, %v1237_v32 }
 0x86f   : > { %v1258_v35 = vpop.f32.mrf.mxu0 }
 0x870   : > { %1569 = vmatmul.msk.f32.vlgmr.msrb.gmra.mxu3 %vm640_vm1, %v1258_v35 }
 0x8f3   : > { %v1283_v41 = vpop.f32.mrf.mxu3 }
 0x8f4   : > { %v1286_v42 = vadd.f32 %v1283_v41, %v1100_v18 }
 0x8f6   : > { %v1291_v43 = vadd.f32 %v1629_v40, %v1286_v42 }
 0x8f8   : > { %1570 = vmatmul.msk.f32.vlgmr.msrb.gmra.mxu0 %vm548_vm0, %v1291_v43 }
 0x975   : > { %v1320_v50 = vpop.f32.mrf.mxu0 }
 0x976   : > { %v1321_v51 = vadd.f32 %v1630_v49, %v1320_v50 }
 0x978   : > { %v1323_v52 = vmul.f32 0.5, %v1321_v51 }
 0x97a   : > { %1571 = vmatmul.msk.f32.vlgmr.msra.gmra.mxu1 %vm548_vm0, %v1323_v52 }
 0x9f7   : > { %v1352_v56 = vpop.f32.mrf.mxu1 }
 0x9f8   : > { %v1353_v57 = vadd.f32 %v1631_v55, %v1352_v56 }
 0x9fa   : > { %1572 = vmatmul.msk.f32.vlgmr.msrb.gmra.mxu2 %vm548_vm0, %v1353_v57 }
 0xa7d   : > { %v1383_v59 = vpop.f32.mrf.mxu2 }
 0xa7e   : > { %v1384_v60 = vadd.f32 %v1632_v58, %v1383_v59 }
 0xa80   : > { %1386 = vst.msk [vmem:[%s527_s18] sm:$0xff] %vm548_vm0, %v1384_v60 }
 0xa81   : > { %1676 = shalt.err (!%p1673_p3)
}
 0xa82   : > { %1578 = dma.vmem_to_hbm [thread:$0]  (%p1836_p5), %s1401_s19, 128, %s1403_s15, %s1388_s21  }
 0xa83 PF: > { %s2251_s24 = sld [smem:[#allocation7_spill]] }
 0xa84   : > { %s2252_s27 = sld [smem:[#allocation5_spill]] }
 0xa89   : > { %p1584_p4 = scmp.ge.s32.totalorder %s2251_s24, 2 }
 0xa8a   : > { %s1414_s17 = sand.u32 1, %s2252_s27  }
 0xa8b   : > { %p1581_p7 = pnand %p1584_p4, %p1840_p6  ;;  %s1415_s18 = scalar_lea.sflag [#allocation3], %s1414_s17 }
 0xa8d   : > { %p1582_p8 = pneg %p1581_p7 }
 0xa8f   : > { %1694 = dma.done.wait (%p1582_p8), %s1415_s18, 128  }
 0xa90   : > { %1696 = vsyncadd (%p1582_p8), %s1415_s18, 4294967168  ;;  %s2254_s24 = sld [smem:[#allocation8_spill]]  ;;  %s2257_s21 = smov %s1703_s22 }
 0xa91   : > { %s2255_s1 = sld [smem:[#allocation6_spill]] }
 0xa92   : > { %s2256_s23 = sld [smem:[#allocation9_spill]] }
 0xa96   : > { %p26_p9 = scmp.ge.s32.totalorder %s2254_s24, 4  }
 0xa97   : > { %s2258_s22 = smov %s2255_s1 }
 0xa98   :  { %28 = sbr.rel (!%p26_p9) target bundleno = 7 (0x7), region = 143 }
 0xa9d   :  { %1421 = vsyncpa [#allocation3], 1 }
 0xa9e   :  { %1423 = vsyncpa [#allocation3 + $0x1], 1 }

</bundles_post_ra>
